<compile_context>
chip_gen: v7x
topology: tpu7x:2x2x1
jax: 0.10.0
libtpu: 0.0.40
codegen_flags: <defaults>
</compile_context>

<pallas_src>
import math

import jax
import jax.numpy as jnp
from jax import lax
from jax.experimental import pallas as pl
from jax.experimental.pallas import tpu as pltpu

_INV_SQRT2 = 1.0 / math.sqrt(2.0)
_LN_EPS = 1e-12


def _gelu(x):
    # exact erf-based gelu, matching the PyTorch reference
    return x * 0.5 * (1.0 + lax.erf(x * _INV_SQRT2))


def _round_up(x, m):
    return (x + m - 1) // m * m


def matching_linear_kernel(x_ref, w1_ref, consts_ref, c_ref, o_ref):
    x = x_ref[...]                                   # (tm, Din) f32 (tail rows of the last
                                                     # partial block may be garbage; per-row
                                                     # math only -> their lanes are discarded)
    consts = consts_ref[...]                         # (3, H): [b1 ; gw_c ; 1/H]
    b1 = consts[0:1, :]                              # (1, H)
    red = consts[1:3, :]                             # (2, H): [gw_c ; 1/H]
    onesh = consts[2:3, :]                           # (1, H): 1/H

    # dense: x @ W1^T + b1   (MXU, full f32 precision)
    h = jnp.dot(x, w1_ref[...],
                preferred_element_type=jnp.float32,
                precision=lax.Precision.HIGHEST) + b1      # (tm, H)

    g = _gelu(h)                                            # (tm, H)

    # Per-row reductions as tiny NT dots (same q@k^T pattern as flash attention, so the big
    # (tm,H) operand is fed to the MXU without a materialized XLU transpose).  Results are
    # already lane-dense (., tm) rows.
    r = lax.dot_general(red, g, (((1,), (1,)), ((), ())),
                        precision=lax.Precision.HIGHEST,
                        preferred_element_type=jnp.float32)       # (2, tm): [dgc ; mean]
    msq = lax.dot_general(onesh, g * g, (((1,), (1,)), ((), ())),
                          precision=lax.Precision.HIGHEST,
                          preferred_element_type=jnp.float32)     # (1, tm): E[g^2]

    dgc = r[0:1, :]                                   # (1, tm)  sum_j gw_c_j * g[m,j]
    mean = r[1:2, :]                                  # (1, tm)
    var = jnp.maximum(msq - mean * mean, 0.0)         # biased variance (clamped vs rounding)
    y = dgc * lax.rsqrt(var + _LN_EPS) + c_ref[0]     # (1, tm) lane-dense

    o_ref[...] = y.astype(o_ref.dtype)


def matching_linear(x, params, *, tm=2048):
    """x: (B, N, D_in) float32. Returns (B, N) float32."""
    w1, b1, gamma, beta, w2, b2 = params
    B, N, Din = x.shape
    H = w1.shape[0]
    M = B * N

    x2d = x.reshape(M, Din).astype(jnp.float32)

    SMALL = 256
    if M <= SMALL:
        # Single exact tile.  Pad at most 7 rows so the sublane dim is a multiple of 8
        # (negligible copy); output block equals the full (1, tm_eff) array.
        tm_eff = _round_up(M, 8)
        if tm_eff != M:
            x2d = jnp.pad(x2d, ((0, tm_eff - M), (0, 0)))
        num_tiles = 1
    else:
        # Multi-tile: tm must be a multiple of 128 so every (1, tm) output block is
        # lane-dense and unmasked; cap it so there are >= 2 tiles (v7x has 2 TensorCores).
        tm_eff = min(_round_up(max(tm, 128), 128), _round_up(pl.cdiv(M, 2), 128))
        num_tiles = pl.cdiv(M, tm_eff)
        # No input padding: the last x block is a partial (ragged) block.
    M_out = num_tiles * tm_eff

    # Resident constants, folded in the wrapper (tiny host-side XLA ops).
    w1_t = jnp.asarray(w1, jnp.float32).T                       # (Din, H)
    b1f = jnp.asarray(b1, jnp.float32)                          # (H,)
    gammaf = jnp.asarray(gamma, jnp.float32)
    betaf = jnp.asarray(beta, jnp.float32)
    w2v = jnp.asarray(w2, jnp.float32)[0]                       # (H,)
    b2f = jnp.asarray(b2, jnp.float32)[0]                       # scalar

    gw = gammaf * w2v                                           # gamma * w2
    gw_c = gw - jnp.sum(gw) / H                                 # folds the -mean*sum(gw) term
    ones_h = jnp.full((H,), 1.0 / H, jnp.float32)
    consts = jnp.stack([b1f, gw_c, ones_h], axis=0)             # (3, H) resident in VMEM
    c = (jnp.dot(betaf, w2v, precision=lax.Precision.HIGHEST) + b2f).reshape(1)  # SMEM scalar

    cost = pl.CostEstimate(
        flops=2 * M * Din * H + 6 * M * H + 8 * M,
        transcendentals=M * H + M,
        bytes_accessed=(M * Din + Din * H + 3 * H + 1 + M_out) * 4,
    )

    out = pl.pallas_call(
        matching_linear_kernel,
        out_shape=jax.ShapeDtypeStruct((1, M_out), jnp.float32),   # lane-dense row output
        grid_spec=pltpu.PrefetchScalarGridSpec(
            num_scalar_prefetch=0,
            grid=(num_tiles,),
            in_specs=[
                pl.BlockSpec((tm_eff, Din), lambda i: (i, 0)),      # x row-tile (last may be partial)
                pl.BlockSpec((Din, H), lambda i: (0, 0)),           # W1^T (resident)
                pl.BlockSpec((3, H), lambda i: (0, 0)),             # [b1 ; gw_c ; 1/H] (resident)
                pl.BlockSpec(memory_space=pltpu.MemorySpace.SMEM),  # folded constant c
            ],
            out_specs=pl.BlockSpec((1, tm_eff), lambda i: (0, i)),
        ),
        compiler_params=pltpu.CompilerParams(
            dimension_semantics=("parallel",),
            vmem_limit_bytes=32 * 1024 * 1024,
        ),
        cost_estimate=cost,
    )(x2d, w1_t, consts, c)

    return out.reshape(M_out)[:M].reshape(B, N)


def init_params(key, input_size=192):
    hidden_size = input_size * 2 // 3          # 128 for input_size=192
    outputdim = 1
    k1, k2, k3, k4, k5, k6 = jax.random.split(key, 6)
    w1 = jax.random.normal(k1, (hidden_size, input_size), jnp.float32) / math.sqrt(input_size)
    b1 = jax.random.normal(k2, (hidden_size,), jnp.float32) * 0.01
    # non-trivial affine so the gamma/beta/w2/b2 fold is actually exercised
    gamma = 1.0 + 0.1 * jax.random.normal(k5, (hidden_size,), jnp.float32)
    beta = 0.01 * jax.random.normal(k6, (hidden_size,), jnp.float32)
    w2 = jax.random.normal(k3, (outputdim, hidden_size), jnp.float32) / math.sqrt(hidden_size)
    b2 = jax.random.normal(k4, (outputdim,), jnp.float32) * 0.01
    return (w1, b1, gamma, beta, w2, b2)


def reference(x, params):
    w1, b1, gamma, beta, w2, b2 = params
    h = jnp.matmul(x, w1.T, precision=lax.Precision.HIGHEST) + b1
    g = h * 0.5 * (1.0 + lax.erf(h / math.sqrt(2.0)))
    mean = jnp.mean(g, axis=-1, keepdims=True)
    var = jnp.mean((g - mean) ** 2, axis=-1, keepdims=True)
    ln = (g - mean) / jnp.sqrt(var + _LN_EPS) * gamma + beta
    return (jnp.matmul(ln, w2.T, precision=lax.Precision.HIGHEST) + b2).squeeze(2)


if __name__ == "__main__":
    key = jax.random.PRNGKey(0)
    kx, kp, kx2, kx3 = jax.random.split(key, 4)

    # small shape consistent with the module: 2 samples, 8 "objects", feature 192
    B, N, D_in = 2, 8, 192
    params = init_params(kp, input_size=D_in)

    x = jax.random.normal(kx, (B, N, D_in), jnp.float32)
    y = jax.block_until_ready(matching_linear(x, params))
    y_ref = reference(x, params)
    assert y.shape == (B, N)
    assert jnp.allclose(y, y_ref, atol=1e-4, rtol=1e-4), "mismatch vs reference (small)"

    # multi-tile path: tm capped so >=2 tiles, ragged (partial) last x block, no wrapper pad
    B2, N2 = 2, 300
    x2 = jax.random.normal(kx2, (B2, N2, D_in), jnp.float32)
    y2 = jax.block_until_ready(matching_linear(x2, params))
    y2_ref = reference(x2, params)
    assert y2.shape == (B2, N2)
    assert jnp.allclose(y2, y2_ref, atol=1e-4, rtol=1e-4), "mismatch vs reference (2 tiles)"

    # default big-tile path (tm=2048) with a ragged tail tile
    B3, N3 = 16, 300
    x3 = jax.random.normal(kx3, (B3, N3, D_in), jnp.float32)
    y3 = jax.block_until_ready(matching_linear(x3, params))
    y3_ref = reference(x3, params)
    assert y3.shape == (B3, N3)
    assert jnp.allclose(y3, y3_ref, atol=1e-4, rtol=1e-4), "mismatch vs reference (tm=2048)"

    print("KERNEL_OK")
</pallas_src>

<mosaic_0001>
module attributes {stable_mosaic.version = 11 : i64} {
  func.func @matching_linear_kernel(%arg0: i32, %arg1: memref<16x192xf32, #tpu.memory_space<vmem>>, %arg2: memref<192x128xf32, #tpu.memory_space<vmem>>, %arg3: memref<3x128xf32, #tpu.memory_space<vmem>>, %arg4: memref<1xf32, #tpu.memory_space<smem>>, %arg5: memref<1x16xf32, #tpu.memory_space<vmem>>) attributes {dimension_semantics = [#tpu.dimension_semantics<parallel>], iteration_bounds = array<i64: 1>, scalar_prefetch = 0 : i64, scratch_operands = 0 : i64, tpu.core_type = #tpu.core_type<tc>, window_params = [{transform_indices = @transform_0, window_bounds = array<i64: 16, 192>}, {pipeline_mode = #tpu.pipeline_mode<synchronous>, transform_indices = @transform_1, window_bounds = array<i64: 192, 128>}, {pipeline_mode = #tpu.pipeline_mode<synchronous>, transform_indices = @transform_2, window_bounds = array<i64: 3, 128>}, {transform_indices = @transform_3, window_bounds = array<i64: 1>}, {transform_indices = @transform_4, window_bounds = array<i64: 1, 16>}]} {
    %c0 = arith.constant 0 : index
    %c0_0 = arith.constant 0 : index
    %0 = vector.load %arg1[%c0, %c0_0] : memref<16x192xf32, #tpu.memory_space<vmem>>, vector<16x192xf32>
    %c0_1 = arith.constant 0 : index
    %c0_2 = arith.constant 0 : index
    %1 = vector.load %arg3[%c0_1, %c0_2] : memref<3x128xf32, #tpu.memory_space<vmem>>, vector<3x128xf32>
    %2 = vector.extract_strided_slice %1 {offsets = [0, 0], sizes = [1, 128], strides = [1, 1]} : vector<3x128xf32> to vector<1x128xf32>
    %3 = vector.extract_strided_slice %1 {offsets = [1, 0], sizes = [2, 128], strides = [1, 1]} : vector<3x128xf32> to vector<2x128xf32>
    %4 = vector.extract_strided_slice %1 {offsets = [2, 0], sizes = [1, 128], strides = [1, 1]} : vector<3x128xf32> to vector<1x128xf32>
    %c0_3 = arith.constant 0 : index
    %c0_4 = arith.constant 0 : index
    %5 = vector.load %arg2[%c0_3, %c0_4] : memref<192x128xf32, #tpu.memory_space<vmem>>, vector<192x128xf32>
    %cst = arith.constant dense<0.000000e+00> : vector<16x128xf32>
    %6 = tpu.matmul %0, %5, %cst {dimension_numbers = #tpu.dot_dimension_numbers<[1], [0], [0], [1], [0, 0, 1, 1], [], []>, precision = #tpu.contract_precision<fp32>} : vector<16x192xf32>, vector<192x128xf32>, vector<16x128xf32> -> vector<16x128xf32>
    %7 = vector.broadcast %2 : vector<1x128xf32> to vector<16x128xf32>
    %8 = arith.addf %6, %7 : vector<16x128xf32>
    %cst_5 = arith.constant 5.000000e-01 : f32
    %9 = vector.broadcast %cst_5 : f32 to vector<16x128xf32>
    %10 = arith.mulf %8, %9 : vector<16x128xf32>
    %cst_6 = arith.constant 0.707106769 : f32
    %11 = vector.broadcast %cst_6 : f32 to vector<16x128xf32>
    %12 = arith.mulf %8, %11 : vector<16x128xf32>
    %13 = math.erf %12 : vector<16x128xf32>
    %cst_7 = arith.constant 1.000000e+00 : f32
    %14 = vector.broadcast %cst_7 : f32 to vector<16x128xf32>
    %15 = arith.addf %14, %13 : vector<16x128xf32>
    %16 = arith.mulf %10, %15 : vector<16x128xf32>
    %cst_8 = arith.constant dense<0.000000e+00> : vector<2x16xf32>
    %17 = tpu.matmul %3, %16, %cst_8 {dimension_numbers = #tpu.dot_dimension_numbers<[1], [1], [0], [0], [0, 0, 1, 0], [], []>, precision = #tpu.contract_precision<fp32>} : vector<2x128xf32>, vector<16x128xf32>, vector<2x16xf32> -> vector<2x16xf32>
    %18 = arith.mulf %16, %16 : vector<16x128xf32>
    %cst_9 = arith.constant dense<0.000000e+00> : vector<1x16xf32>
    %19 = tpu.matmul %4, %18, %cst_9 {dimension_numbers = #tpu.dot_dimension_numbers<[1], [1], [0], [0], [0, 0, 1, 0], [], []>, precision = #tpu.contract_precision<fp32>} : vector<1x128xf32>, vector<16x128xf32>, vector<1x16xf32> -> vector<1x16xf32>
    %20 = vector.extract_strided_slice %17 {offsets = [0, 0], sizes = [1, 16], strides = [1, 1]} : vector<2x16xf32> to vector<1x16xf32>
    %21 = vector.extract_strided_slice %17 {offsets = [1, 0], sizes = [1, 16], strides = [1, 1]} : vector<2x16xf32> to vector<1x16xf32>
    %22 = arith.mulf %21, %21 : vector<1x16xf32>
    %23 = arith.subf %19, %22 : vector<1x16xf32>
    %cst_10 = arith.constant 0.000000e+00 : f32
    %24 = vector.broadcast %cst_10 : f32 to vector<1x16xf32>
    %25 = arith.maximumf %23, %24 : vector<1x16xf32>
    %cst_11 = arith.constant 9.99999996E-13 : f32
    %26 = vector.broadcast %cst_11 : f32 to vector<1x16xf32>
    %27 = arith.addf %25, %26 : vector<1x16xf32>
    %28 = math.rsqrt %27 : vector<1x16xf32>
    %29 = arith.mulf %20, %28 : vector<1x16xf32>
    %c0_12 = arith.constant 0 : index
    %30 = memref.load %arg4[%c0_12] : memref<1xf32, #tpu.memory_space<smem>>
    %31 = vector.broadcast %30 : f32 to vector<1x16xf32>
    %32 = arith.addf %29, %31 : vector<1x16xf32>
    %c0_13 = arith.constant 0 : index
    %c0_14 = arith.constant 0 : index
    %33 = vector.load %arg5[%c0_13, %c0_14] : memref<1x16xf32, #tpu.memory_space<vmem>>, vector<1x16xf32>
    tpu.vector_store %arg5[%c0_13, %c0_14], %32 {strides = array<i32>} : memref<1x16xf32, #tpu.memory_space<vmem>>, vector<1x16xf32>,
    return
  }
  func.func @transform_0(%arg0: i32) -> (i32, i32) {
    %c0_i32 = arith.constant 0 : i32
    %c0_i32_0 = arith.constant 0 : i32
    return %arg0, %c0_i32 : i32, i32
  }
  func.func @transform_1(%arg0: i32) -> (i32, i32) {
    %c0_i32 = arith.constant 0 : i32
    %c0_i32_0 = arith.constant 0 : i32
    %c0_i32_1 = arith.constant 0 : i32
    return %c0_i32, %c0_i32_0 : i32, i32
  }
  func.func @transform_2(%arg0: i32) -> (i32, i32) {
    %c0_i32 = arith.constant 0 : i32
    %c0_i32_0 = arith.constant 0 : i32
    %c0_i32_1 = arith.constant 0 : i32
    return %c0_i32, %c0_i32_0 : i32, i32
  }
  func.func @transform_3(%arg0: i32) -> i32 {
    %c0_i32 = arith.constant 0 : i32
    %c0_i32_0 = arith.constant 0 : i32
    return %c0_i32 : i32
  }
  func.func @transform_4(%arg0: i32) -> (i32, i32) {
    %c0_i32 = arith.constant 0 : i32
    %c0_i32_0 = arith.constant 0 : i32
    return %c0_i32, %arg0 : i32, i32
  }
}

</mosaic_0001>

<bundles_post_ra>
// kernel: tpu_custom_call.1
= control target key start
LH: loop header
LB: loop body
LE: loop exit
PB: predicated region body
PF: predicated region fallthrough
CT: control target
= control target key end

     0   :  { %10 = vsyncpa [#allocation4], 0  ;;  %s2977_s0 = inlined_call_operand.hbm [shape: f32[16,192], index: 0, kind: input, shape index: {}]   ;;  %s2978_s1 = inlined_call_operand.hbm [shape: f32[192,128], index: 1, kind: input, shape index: {}]   ;;  %s2979_s2 = inlined_call_operand.vmem [shape: f32[3,128], index: 2, kind: input, shape index: {}]   ;;  %s2980_s3 = inlined_call_operand.<no memory space> [shape: f32[1], index: 3, kind: input, shape index: {}]   ;;  %s2981_s4 = inlined_call_operand.hbm [shape: f32[1,16], index: 4, kind: output, shape index: {}]  }
   0x1   :  { %11 = vsyncpa [#allocation7], 0 }
   0x2   :  { %12 = vsyncpa [#allocation5], 0  ;;  %s2366_s15 = smov [#allocation3]   ;;  %s2294_s19 = scalar_lea.hbm %s2977_s0, 512 }
   0x3   :  { %s18_s16 = sshll.u32 %s2366_s15, 4  ;;  %p2295_p0 = scmp.ne.s32.totalorder %s2977_s0, %s2294_s19  ;;  %s19_s16 = int_to_ptr.vmem [resolvable:$true] %s18_s16 }
   0x4   :  { %p2298_p1 = scmp.lt.u32.totalorder %s2294_s19, %s2977_s0 }
   0x6   :  { %p2300_p2 = pnand %p2298_p1, %p2295_p0 }
   0x8   :  { %2303 = shalt.err (!%p2300_p2)
}
   0x9   :  { %s2304_s24 = scalar_lea.vmem %s19_s16, 512  ;;  %p2309_p4 = scmp.lt.s32.totalorder %s19_s16, %s19_s16 }
   0xa   :  { %p2305_p3 = scmp.ne.s32.totalorder %s19_s16, %s2304_s24  ;;  %p2310_p5 = scmp.lt.s32.totalorder %s2304_s24, %s2304_s24 }
   0xc   :  { %p2311_p6 = por %p2310_p5, %p2309_p4 }
   0xe   :  { %p2312_p7 = pnand %p2311_p6, %p2305_p3 }
  0x10   :  { %2315 = shalt.err (!%p2312_p7)
}
  0x11   :  { %s2367_s25 = smov 256   ;;  %s2368_s26 = smov 16  }
  0x12   :  { %24 = dma.hbm_to_vmem [thread:$0]  %s2977_s0, 512, %s19_s16, [#allocation4], %s2367_s25, %s2367_s25, %s2368_s26  }
  0x13   :  { %s2369_s29 = smov [#allocation6]   ;;  %s2316_s7 = scalar_lea.hbm %s2978_s1, 3072 }
  0x14   :  { %s30_s30 = sshll.u32 %s2369_s29, 4  ;;  %p2317_p8 = scmp.ne.s32.totalorder %s2978_s1, %s2316_s7  ;;  %s31_s30 = int_to_ptr.vmem [resolvable:$true] %s30_s30 }
  0x15   :  { %p2320_p9 = scmp.lt.u32.totalorder %s2316_s7, %s2978_s1 }
  0x17   :  { %p2322_p10 = pnand %p2320_p9, %p2317_p8 }
  0x19   :  { %2325 = shalt.err (!%p2322_p10)
}
  0x1a   :  { %s2326_s12 = scalar_lea.vmem %s31_s30, 3072  ;;  %p2331_p12 = scmp.lt.s32.totalorder %s31_s30, %s31_s30 }
  0x1b   :  { %p2327_p11 = scmp.ne.s32.totalorder %s31_s30, %s2326_s12  ;;  %p2332_p13 = scmp.lt.s32.totalorder %s2326_s12, %s2326_s12 }
  0x1d   :  { %p2333_p0 = por %p2332_p13, %p2331_p12 }
  0x1f   :  { %p2334_p1 = pnand %p2333_p0, %p2327_p11 }
  0x21   :  { %2337 = shalt.err (!%p2334_p1)
}
  0x22   :  { %s2370_s0 = smov 128   ;;  %s2371_s13 = smov 8  }
  0x23   :  { %36 = dma.hbm_to_vmem [thread:$0]  %s2978_s1, 3072, %s31_s30, [#allocation7], %s2370_s0, %s2370_s0, %s2371_s13  }
  0x24   :  { %2360 = dma.done.wait [#allocation4], 512  }
  0x25   :  { %2361 = vsyncadd [#allocation4], 4294966784 }
  0x26   :  { %2362 = dma.done.wait [#allocation7], 3072  }
  0x27   :  { %2363 = vsyncadd [#allocation7], 4294964224  ;;  %v2372_v0 = vmov 0.0|0.0   ;;  %v52_v1 = vld [vmem:[#allocation6] sm:$0xff]  ;;  %v53_v2 = vld [vmem:[#allocation6 + $0x8] sm:$0xff]  ;;  %vm80_vm0 = vcmask 523264  }
  0x28   :  { %2058 = vmatprep.subr.bf16.mxu0 %v2372_v0  ;;  %1986 = vmatprep.subr.bf16.mxu1 %v2372_v0  ;;  %v54_v3 = vld [vmem:[#allocation6 + $0x10] sm:$0xff]  ;;  %v88_v4 = vand.u32 4294901760, %v52_v1  ;;  %v91_v5 = vand.u32 4294901760, %v53_v2  ;;  %v55_v6 = vld [vmem:[#allocation6 + $0x18] sm:$0xff]  ;;  %v56_v8 = vld [vmem:[#allocation6 + $0x20] sm:$0xff]  ;;  %vm2373_vm1 = vmmov 0  }
  0x29   :  { %v94_v7 = vand.u32 4294901760, %v54_v3  ;;  %v57_v9 = vld [vmem:[#allocation6 + $0x28] sm:$0xff]  ;;  %v97_v10 = vand.u32 4294901760, %v55_v6  ;;  %v100_v11 = vand.u32 4294901760, %v56_v8  ;;  %v2433_v16 = vld [vmem:[#allocation6 + $0x30] sm:$0xff]  ;;  %v2437_v18 = vld [vmem:[#allocation6 + $0x38] sm:$0xff] }
  0x2a   :  { %v2427_v12 = vsub.f32 %v52_v1, %v88_v4  ;;  %v2429_v13 = vsub.f32 %v53_v2, %v91_v5  ;;  %v103_v15 = vand.u32 4294901760, %v57_v9  ;;  %v106_v20 = vand.u32 4294901760, %v2433_v16  ;;  %v2450_v25 = vld [vmem:[#allocation6 + $0x40] sm:$0xff]  ;;  %v2452_v26 = vld [vmem:[#allocation6 + $0x48] sm:$0xff]  ;;  %v2464_v32 = vld [vmem:[#allocation6 + $0x50] sm:$0xff]  ;;  %s2375_s18 = smov [#allocation8]  }
  0x2b   :  { %v2431_v14 = vsub.f32 %v54_v3, %v94_v7  ;;  %v2435_v17 = vsub.f32 %v55_v6, %v97_v10  ;;  %v2444_v22 = vsub.f32 %v56_v8, %v100_v11  ;;  %v109_v24 = vand.u32 4294901760, %v2437_v18  ;;  %v2466_v33 = vld [vmem:[#allocation6 + $0x58] sm:$0xff]  ;;  %v48_v34 = vld [vmem:[#allocation3 + $0x8] sm:$0xff]  ;;  %v2479_v40 = vld [vmem:[#allocation6 + $0x60] sm:$0xff]  ;;  %s1856_s19 = sshll.u32 %s2375_s18, 4  ;;  %s1857_s19 = int_to_ptr.vmem [resolvable:$true] %s1856_s19 }
  0x2c   :  { %v2059_v19 = vpack.c.bf16 %v2429_v13, %v2427_v12  ;;  %v2446_v23 = vsub.f32 %v57_v9, %v103_v15  ;;  %v2455_v27 = vsub.f32 %v2433_v16, %v106_v20  ;;  %v112_v30 = vand.u32 4294901760, %v2450_v25  ;;  %v2481_v41 = vld [vmem:[#allocation6 + $0x68] sm:$0xff]  ;;  %v2507_v51 = vld [vmem:[#allocation6 + $0x70] sm:$0xff]  ;;  %v2513_v53 = vld [vmem:[#allocation6 + $0x78] sm:$0xff]  ;;  %s2338_s20 = scalar_lea.vmem %s1857_s19, 16  ;;  %s2342_s21 = scalar_lea.vmem %s1857_s19, 32 }
  0x2d   :  { %v2062_v21 = vpack.c.bf16 %v2435_v17, %v2431_v14  ;;  %v2460_v29 = vsub.f32 %v2437_v18, %v109_v24  ;;  %v115_v31 = vand.u32 4294901760, %v2452_v26  ;;  %v118_v35 = vand.u32 4294901760, %v2464_v32  ;;  %v2539_v62 = vld [vmem:[#allocation6 + $0x80] sm:$0xff]  ;;  %v2541_v63 = vld [vmem:[#allocation6 + $0x88] sm:$0xff]  ;;  %v2557_v8 = vld [vmem:[#allocation6 + $0x90] sm:$0xff]  ;;  %p2339_p2 = scmp.ne.s32.totalorder %s1857_s19, %s2338_s20  ;;  %p2343_p3 = scmp.lt.s32.totalorder %s1857_s19, %s1857_s19 }
  0x2e   :  { %2060 = vmatpush1.bf16.msra.mxu0 %v2059_v19  ;;  %v2065_v28 = vpack.c.bf16 %v2446_v23, %v2444_v22  ;;  %v121_v36 = vand.u32 4294901760, %v2466_v33  ;;  %v2474_v38 = vsub.f32 %v2450_v25, %v112_v30  ;;  %v2483_v42 = vpack.c.bf16 %v91_v5, %v88_v4  ;;  %v71_v9 = vld [vmem:[#allocation6 + $0x98] sm:$0xff]  ;;  %p2344_p4 = scmp.lt.s32.totalorder %s2342_s21, %s2338_s20 }
  0x2f   :  { %2061 = vmatprep.subr.bf16.mxu0 %v2372_v0  ;;  %v2068_v37 = vpack.c.bf16 %v2460_v29, %v2455_v27  ;;  %v2477_v39 = vsub.f32 %v2452_v26, %v115_v31  ;;  %v82_v43 = vsel %vm80_vm0, %v48_v34, 0  ;;  %v2490_v45 = vpack.c.bf16 %v97_v10, %v94_v7  ;;  %v2589_v34 = vld [vmem:[#allocation6 + $0xb0] sm:$0xff] }
  0x30   :  { %1988 = vmatpush1.bf16.msra.mxu1 %v2483_v42  ;;  %v2488_v44 = vand.u32 4294901760, %v82_v43  ;;  %v124_v46 = vand.u32 4294901760, %v2479_v40  ;;  %v127_v47 = vand.u32 4294901760, %v2481_v41  ;;  %v2500_v49 = vsub.f32 %v2464_v32, %v118_v35  ;;  %v2592_v32 = vld [vmem:[#allocation6 + $0xb8] sm:$0xff]  ;;  %p2345_p5 = por %p2344_p4, %p2343_p3 }
  0x31   :  { %1989 = vmatprep.subr.bf16.mxu1 %v2372_v0  ;;  %v2071_v48 = vpack.c.bf16 %v2477_v39, %v2474_v38  ;;  %v2505_v50 = vsub.f32 %v2466_v33, %v121_v36  ;;  %v2517_v54 = vpack.c.bf16 %v103_v15, %v100_v11  ;;  %v130_v57 = vand.u32 4294901760, %v2507_v51 }
  0x32   :  { %2063 = vmatpush1.bf16.msra.mxu0 %v2062_v21  ;;  %v2510_v52 = vsub.f32 %v82_v43, %v2488_v44  ;;  %v2523_v56 = vsub.f32 %v2479_v40, %v124_v46  ;;  %v2532_v59 = vsub.f32 %v2481_v41, %v127_v47  ;;  %v133_v60 = vand.u32 4294901760, %v2513_v53  ;;  %v73_v21 = vld [vmem:[#allocation6 + $0xa8] sm:$0xff]  ;;  %v50_v41 = vld [vmem:[#allocation3 + $0x18] sm:$0xff]  ;;  %p2346_p6 = pnand %p2345_p5, %p2339_p2 }
  0x33   :  { %2064 = vmatprep.subr.bf16.mxu0 %v2372_v0  ;;  %v2074_v58 = vpack.c.bf16 %v2505_v50, %v2500_v49  ;;  %v2544_v1 = vpack.c.bf16 %v109_v24, %v106_v20  ;;  %v2547_v3 = vsub.f32 %v2507_v51, %v130_v57  ;;  %v136_v6 = vand.u32 4294901760, %v2539_v62  ;;  %v72_v20 = vld [vmem:[#allocation6 + $0xa0] sm:$0xff] }
  0x34   :  { %519 = vmatprep.mubr.f32.mxu0 %v2510_v52  ;;  %1991 = vmatpush1.bf16.msra.mxu1 %v2490_v45  ;;  %v177_v55 = vand.u32 4294901760, %v2510_v52  ;;  %v2077_v4 = vpack.c.bf16 %v2532_v59, %v2523_v56  ;;  %v2553_v5 = vsub.f32 %v2513_v53, %v133_v60  ;;  %v139_v7 = vand.u32 4294901760, %v2541_v63 }
  0x35   :  { %1992 = vmatprep.subr.bf16.mxu1 %v2372_v0  ;;  %v2561_v10 = vpack.c.bf16 %v115_v31, %v112_v30  ;;  %v142_v11 = vand.u32 4294901760, %v2557_v8  ;;  %v2568_v16 = vsub.f32 %v2539_v62, %v136_v6  ;;  %v145_v19 = vand.u32 4294901760, %v71_v9 }
  0x36   :  { %2066 = vmatpush1.bf16.msra.mxu0 %v2065_v28  ;;  %v178_v61 = vsub.f32 %v2510_v52, %v177_v55  ;;  %v2080_v15 = vpack.c.bf16 %v2553_v5, %v2547_v3  ;;  %v2571_v18 = vsub.f32 %v2541_v63, %v139_v7  ;;  %v2579_v24 = vpack.c.bf16 %v121_v36, %v118_v35 }
  0x37   :  { %2067 = vmatprep.subr.bf16.mxu0 %v2372_v0  ;;  %v2582_v25 = vsub.f32 %v2557_v8, %v142_v11  ;;  %v2587_v28 = vsub.f32 %v71_v9, %v145_v19  ;;  %v148_v30 = vand.u32 4294901760, %v72_v20  ;;  %v151_v31 = vand.u32 4294901760, %v73_v21 }
  0x38   :  { %1994 = vmatpush1.bf16.msra.mxu1 %v2517_v54  ;;  %v179_v2 = vand.u32 4294901760, %v178_v61  ;;  %v2083_v26 = vpack.c.bf16 %v2571_v18, %v2568_v16  ;;  %v2599_v33 = vpack.c.bf16 %v127_v47, %v124_v46  ;;  %v154_v35 = vand.u32 4294901760, %v2589_v34  ;;  %v47_v46 = vld [vmem:[#allocation3] sm:$0xff] }
  0x39   :  { %1995 = vmatprep.subr.bf16.mxu1 %v2372_v0  ;;  %v2086_v36 = vpack.c.bf16 %v2587_v28, %v2582_v25  ;;  %v2607_v43 = vsub.f32 %v73_v21, %v151_v31  ;;  %v2612_v40 = vpack.c.bf16 %v133_v60, %v130_v57  ;;  %v2625_v57 = vand.u32 4294901760, %v47_v46 }
  0x3a   :  { %2069 = vmatpush1.bf16.msra.mxu0 %v2068_v37  ;;  %180 = vmatprep.mubr.f32.mxu1 %v179_v2  ;;  %v2605_v37 = vsub.f32 %v72_v20, %v148_v30  ;;  %v2618_v51 = vsub.f32 %v2589_v34, %v154_v35  ;;  %v2628_v60 = vpack.c.bf16 %v139_v7, %v136_v6  ;;  %v209_v61 = vand.u32 4294901760, %v2427_v12 }
  0x3b   :  { %2070 = vmatprep.subr.bf16.mxu0 %v2372_v0  ;;  %v216_v62 = vand.u32 4294901760, %v2429_v13  ;;  %v2639_v8 = vsub.f32 %v47_v46, %v2625_v57  ;;  %v2642_v6 = vpack.c.bf16 %v145_v19, %v142_v11  ;;  %v2982_v11 = vand.u32 4294901760, %v2431_v14 }
  0x3c   :  { %1997 = vmatpush1.bf16.msra.mxu1 %v2544_v1  ;;  %v2089_v47 = vpack.c.bf16 %v2607_v43, %v2605_v37  ;;  %v210_v20 = vsub.f32 %v2427_v12, %v209_v61  ;;  %v2660_v19 = vpack.c.bf16 %v151_v31, %v148_v30  ;;  %v2985_v46 = vand.u32 4294901760, %v2444_v22 }
  0x3d   :  { %1998 = vmatprep.subr.bf16.mxu1 %v2372_v0  ;;  %v217_v21 = vsub.f32 %v2429_v13, %v216_v62  ;;  %vm1848_vm2 = vcmask 122880  }
  0x3e   :  { %2072 = vmatpush1.bf16.msra.mxu0 %v2071_v48  ;;  %v157_v48 = vand.u32 4294901760, %v2592_v32  ;;  %v211_v31 = vand.u32 4294901760, %v210_v20 }
  0x3f   :  { %2073 = vmatprep.subr.bf16.mxu0 %v2372_v0 }
  0x40   :  { %2000 = vmatpush1.bf16.msra.mxu1 %v2561_v10  ;;  %v2621_v53 = vsub.f32 %v2592_v32, %v157_v48 }
  0x41   :  { %2001 = vmatprep.subr.bf16.mxu1 %v2372_v0 }
  0x42   :  { %2075 = vmatpush1.bf16.msra.mxu0 %v2074_v58  ;;  %v85_v58 = vsel %vm80_vm0, %v50_v41, 0  ;;  %v2092_v63 = vpack.c.bf16 %v2621_v53, %v2618_v51  ;;  %v224_v41 = vsub.f32 %v2431_v14, %v2982_v11 }
  0x43   :  { %2076 = vmatprep.subr.bf16.mxu0 %v2372_v0  ;;  %v2635_v2 = vand.u32 4294901760, %v85_v58 }
  0x44   :  { %2003 = vmatpush1.bf16.msra.mxu1 %v2579_v24 }
  0x45   :  { %2004 = vmatprep.subr.bf16.mxu1 %v2372_v0  ;;  %v2648_v9 = vsub.f32 %v85_v58, %v2635_v2  ;;  %v2681_v58 = vpack.c.bf16 %v157_v48, %v154_v35  ;;  %v225_v35 = vand.u32 4294901760, %v224_v41  ;;  %v238_v48 = vsub.f32 %v2444_v22, %v2985_v46 }
  0x46   :  { %2078 = vmatpush1.bf16.msra.mxu0 %v2077_v4  ;;  %v49_v4 = vld [vmem:[#allocation3 + $0x10] sm:$0xff]  ;;  %v265_v41 = vand.u32 4294901760, %v2474_v38 }
  0x47   :  { %2079 = vmatprep.subr.bf16.mxu0 %v2372_v0  ;;  %v2645_v7 = vand.u32 4294901760, %v49_v4  ;;  %v2983_v34 = vand.u32 4294901760, %v2648_v9  ;;  %v3003_v13 = vand.u32 4294901760, %v2648_v9 }
  0x48   :  { %2006 = vmatpush1.bf16.msra.mxu1 %v2599_v33 }
  0x49   :  { %2007 = vmatprep.subr.bf16.mxu1 %v2372_v0  ;;  %v2667_v32 = vsub.f32 %v49_v4, %v2645_v7  ;;  %v2986_v4 = vand.u32 4294901760, %v2446_v23  ;;  %v193_v20 = vsub.f32 %v2648_v9, %v2983_v34  ;;  %v251_v34 = vand.u32 4294901760, %v2455_v27 }
  0x4a   :  { %2081 = vmatpush1.bf16.msra.mxu0 %v2080_v15  ;;  %v2988_v15 = vand.u32 4294901760, %v2639_v8 }
  0x4b   :  { %2082 = vmatprep.subr.bf16.mxu0 %v2372_v0  ;;  %v245_v52 = vsub.f32 %v2446_v23, %v2986_v4 }
  0x4c   :  { %2009 = vmatpush1.bf16.msra.mxu1 %v2612_v40  ;;  %v184_v30 = vsub.f32 %v2639_v8, %v2988_v15 }
  0x4d   :  { %2010 = vmatprep.subr.bf16.mxu1 %v2372_v0 }
  0x4e   :  { %2084 = vmatpush1.bf16.msra.mxu0 %v2083_v26  ;;  %v2984_v26 = vand.u32 4294901760, %v2435_v17 }
  0x4f   :  { %2085 = vmatprep.subr.bf16.mxu0 %v2372_v0 }
  0x50   :  { %2012 = vmatpush1.bf16.msra.mxu1 %v2628_v60 }
  0x51   :  { %2013 = vmatprep.subr.bf16.mxu1 %v2372_v0 }
  0x52   :  { %2087 = vmatpush1.bf16.msra.mxu0 %v2086_v36  ;;  %v218_v36 = vand.u32 4294901760, %v217_v21  ;;  %v185_v21 = vand.u32 4294901760, %v184_v30 }
  0x53   :  { %2088 = vmatprep.subr.bf16.mxu0 %v2372_v0 }
  0x54   :  { %2015 = vmatpush1.bf16.msra.mxu1 %v2642_v6  ;;  %v2023_v11 = vpack.c.bf16 %v218_v36, %v211_v31  ;;  %v194_v31 = vand.u32 4294901760, %v193_v20  ;;  %v252_v36 = vsub.f32 %v2455_v27, %v251_v34  ;;  %v246_v20 = vand.u32 4294901760, %v245_v52 }
  0x55   :  { %2016 = vmatprep.subr.bf16.mxu1 %v2372_v0  ;;  %v2990_v52 = vand.u32 4294901760, %v2505_v50  ;;  %v3008_v27 = vand.u32 4294901760, %v2500_v49 }
  0x56   :  { %2090 = vmatpush1.bf16.msra.mxu0 %v2089_v47  ;;  %v2987_v47 = vand.u32 4294901760, %v2667_v32 }
  0x57   :  { %2091 = vmatprep.subr.bf16.mxu0 %v2372_v0 }
  0x58   :  { %2018 = vmatpush1.bf16.msra.mxu1 %v2660_v19 }
  0x59   :  { %2019 = vmatprep.subr.bf16.mxu1 %v2372_v0 }
  0x5a   :  { %2093 = vmatpush1.bf16.msra.mxu0 %v2092_v63  ;;  %v231_v63 = vsub.f32 %v2435_v17, %v2984_v26  ;;  %v199_v26 = vsub.f32 %v2667_v32, %v2987_v47  ;;  %v239_v47 = vand.u32 4294901760, %v238_v48 }
  0x5b   :  { %2094 = vmatprep.subr.bf16.mxu0 %v2372_v0 }
  0x5c   :  { %2021 = vmatpush1.bf16.msra.mxu1 %v2681_v58  ;;  %v232_v30 = vand.u32 4294901760, %v231_v63  ;;  %v2989_v63 = vand.u32 4294901760, %v2477_v39  ;;  %v200_v46 = vand.u32 4294901760, %v199_v26  ;;  %v266_v26 = vsub.f32 %v2474_v38, %v265_v41 }
  0x5d   :  { %522 = vmatmul.mubr.f32.vlgmr.msra.gmra.mrb[0].mxu0 %v2639_v8  ;;  %2022 = vmatprep.subr.bf16.mxu1 %v2372_v0  ;;  %v3011_v38 = vand.u32 4294901760, %v2532_v59 }
  0x5e   :  { %2096 = vmatpush1.bf16.msra.mxu0 %v2483_v42  ;;  %528 = vmatprep.mubr.f32.mxu0 %v2648_v9  ;;  %v2026_v4 = vpack.c.bf16 %v232_v30, %v225_v35  ;;  %v2029_v35 = vpack.c.bf16 %v246_v20, %v239_v47  ;;  %v2992_v30 = vand.u32 4294901760, %v2500_v49 }
  0x5f   :  { %2097 = vmatprep.subr.bf16.mxu0 %v2372_v0  ;;  %186 = vmatmul.mubr.f32.vlgmr.msra.gmra.mrb[0].mxu1 %v185_v21  ;;  %v253_v21 = vand.u32 4294901760, %v252_v36 }
  0x60   :  { %2024 = vmatpush1.bf16.msra.mxu1 %v2023_v11  ;;  %195 = vmatprep.mubr.f32.mxu1 %v194_v31  ;;  %v273_v11 = vsub.f32 %v2477_v39, %v2989_v63  ;;  %v267_v31 = vand.u32 4294901760, %v266_v26  ;;  %v2991_v63 = vand.u32 4294901760, %v2523_v56  ;;  %v280_v47 = vsub.f32 %v2500_v49, %v2992_v30 }
  0x61   :  { %531 = vmatmul.mubr.f32.gmra.mrb[2].mxu0 %v2667_v32  ;;  %2025 = vmatprep.subr.bf16.mxu1 %v2372_v0  ;;  %v328_v30 = vand.u32 4294901760, %v2571_v18  ;;  %v3014_v49 = vand.u32 4294901760, %v2568_v16 }
  0x62   :  { %2099 = vmatpush1.bf16.msra.mxu0 %v2490_v45  ;;  %627 = vmatprep.mubr.f32.mxu0 %v177_v55  ;;  %v258_v55 = vand.u32 4294901760, %v2460_v29  ;;  %v274_v36 = vand.u32 4294901760, %v273_v11  ;;  %v294_v26 = vsub.f32 %v2523_v56, %v2991_v63  ;;  %v281_v11 = vand.u32 4294901760, %v280_v47 }
  0x63   :  { %2100 = vmatprep.subr.bf16.mxu0 %v2372_v0  ;;  %201 = vmatmul.mubr.f32.gmra.mrb[2].mxu1 %v200_v46  ;;  %v2996_v46 = vand.u32 4294901760, %v2532_v59  ;;  %v2995_v63 = vand.u32 4294901760, %v2568_v16 }
  0x64   :  { %v259_v15 = vsub.f32 %v2460_v29, %v258_v55  ;;  %2027 = vmatpush1.bf16.msra.mxu1 %v2026_v4  ;;  %391 = vmatprep.mubr.f32.mxu1 %v2488_v44  ;;  %v287_v4 = vsub.f32 %v2505_v50, %v2990_v52  ;;  %v2035_v20 = vpack.c.bf16 %v274_v36, %v267_v31  ;;  %v2993_v52 = vand.u32 4294901760, %v2553_v5 }
  0x65   :  { %2028 = vmatprep.subr.bf16.mxu1 %v2372_v0  ;;  %v295_v31 = vand.u32 4294901760, %v294_v26  ;;  %v3009_v29 = vand.u32 4294901760, %v2505_v50  ;;  %v2155_v50 = vpack.c.bf16 %v328_v30, %v3014_v49 }
  0x66   :  { %2102 = vmatpush1.bf16.msra.mxu0 %v2517_v54  ;;  %v260_v48 = vand.u32 4294901760, %v259_v15 }
  0x67   :  { %2103 = vmatprep.subr.bf16.mxu0 %v2372_v0  ;;  %v2146_v9 = vpack.c.bf16 %v3009_v29, %v3008_v27 }
  0x68   :  { %2030 = vmatpush1.bf16.msra.mxu1 %v2029_v35  ;;  %v2032_v15 = vpack.c.bf16 %v260_v48, %v253_v21  ;;  %v301_v21 = vsub.f32 %v2532_v59, %v2996_v46  ;;  %v288_v35 = vand.u32 4294901760, %v287_v4  ;;  %v2994_v48 = vand.u32 4294901760, %v2547_v3 }
  0x69   :  { %2031 = vmatprep.subr.bf16.mxu1 %v2372_v0  ;;  %v315_v4 = vsub.f32 %v2553_v5, %v2993_v52  ;;  %v2998_v52 = vand.u32 4294901760, %v2582_v25  ;;  %v356_v46 = vand.u32 4294901760, %v2607_v43  ;;  %v3016_v59 = vand.u32 4294901760, %v2587_v28 }
  0x6a   :  { %2105 = vmatpush1.bf16.msra.mxu0 %v2544_v1  ;;  %v302_v36 = vand.u32 4294901760, %v301_v21  ;;  %v308_v47 = vsub.f32 %v2547_v3, %v2994_v48  ;;  %v329_v21 = vsub.f32 %v2571_v18, %v328_v30  ;;  %v2997_v48 = vand.u32 4294901760, %v2587_v28 }
  0x6b   :  { %2106 = vmatprep.subr.bf16.mxu0 %v2372_v0 }
  0x6c   :  { %2033 = vmatpush1.bf16.msra.mxu1 %v2032_v15  ;;  %v2038_v15 = vpack.c.bf16 %v288_v35, %v281_v11  ;;  %v2041_v26 = vpack.c.bf16 %v302_v36, %v295_v31  ;;  %v309_v11 = vand.u32 4294901760, %v308_v47  ;;  %v316_v35 = vand.u32 4294901760, %v315_v4 }
  0x6d   :  { %2034 = vmatprep.subr.bf16.mxu1 %v2372_v0  ;;  %v330_v36 = vand.u32 4294901760, %v329_v21  ;;  %v336_v47 = vsub.f32 %v2582_v25, %v2998_v52  ;;  %v343_v4 = vsub.f32 %v2587_v28, %v2997_v48  ;;  %v357_v21 = vsub.f32 %v2607_v43, %v356_v46 }
  0x6e   :  { %2108 = vmatpush1.bf16.msra.mxu0 %v2561_v10  ;;  %v363_v48 = vand.u32 4294901760, %v2618_v51  ;;  %v370_v52 = vand.u32 4294901760, %v2621_v53 }
  0x6f   :  { %2109 = vmatprep.subr.bf16.mxu0 %v2372_v0 }
  0x70   :  { %2036 = vmatpush1.bf16.msra.mxu1 %v2035_v20  ;;  %v322_v20 = vsub.f32 %v2568_v16, %v2995_v63  ;;  %v2999_v63 = vand.u32 4294901760, %v2605_v37  ;;  %v2164_v16 = vpack.c.bf16 %v370_v52, %v363_v48 }
  0x71   :  { %2037 = vmatprep.subr.bf16.mxu1 %v2372_v0 }
  0x72   :  { %2111 = vmatpush1.bf16.msra.mxu0 %v2579_v24  ;;  %v323_v31 = vand.u32 4294901760, %v322_v20 }
  0x73   :  { %2112 = vmatprep.subr.bf16.mxu0 %v2372_v0 }
  0x74   :  { %2039 = vmatpush1.bf16.msra.mxu1 %v2038_v15  ;;  %v2044_v15 = vpack.c.bf16 %v316_v35, %v309_v11  ;;  %v2047_v20 = vpack.c.bf16 %v330_v36, %v323_v31  ;;  %v337_v11 = vand.u32 4294901760, %v336_v47  ;;  %v344_v35 = vand.u32 4294901760, %v343_v4 }
  0x75   :  { %2040 = vmatprep.subr.bf16.mxu1 %v2372_v0  ;;  %v371_v47 = vsub.f32 %v2621_v53, %v370_v52  ;;  %v2131_v4 = vpack.c.bf16 %v216_v62, %v209_v61  ;;  %v3001_v53 = vand.u32 4294901760, %v2431_v14  ;;  %v3004_v62 = vand.u32 4294901760, %v2667_v32 }
  0x76   :  { %2114 = vmatpush1.bf16.msra.mxu0 %v2599_v33  ;;  %v2050_v36 = vpack.c.bf16 %v344_v35, %v337_v11  ;;  %v3000_v11 = vand.u32 4294901760, %v2639_v8  ;;  %v3002_v35 = vand.u32 4294901760, %v2435_v17  ;;  %v3005_v8 = vand.u32 4294901760, %v2444_v22 }
  0x77   :  { %2115 = vmatprep.subr.bf16.mxu0 %v2372_v0  ;;  %v3006_v14 = vand.u32 4294901760, %v2446_v23  ;;  %v2140_v17 = vpack.c.bf16 %v258_v55, %v251_v34  ;;  %v3007_v22 = vand.u32 4294901760, %v2477_v39  ;;  %v3010_v34 = vand.u32 4294901760, %v2523_v56 }
  0x78   :  { %2042 = vmatpush1.bf16.msra.mxu1 %v2041_v26  ;;  %v350_v26 = vsub.f32 %v2605_v37, %v2999_v63  ;;  %v358_v63 = vand.u32 4294901760, %v357_v21  ;;  %v372_v21 = vand.u32 4294901760, %v371_v47  ;;  %v2134_v12 = vpack.c.bf16 %v3002_v35, %v3001_v53 }
  0x79   :  { %2043 = vmatprep.subr.bf16.mxu1 %v2372_v0  ;;  %v2143_v23 = vpack.c.bf16 %v3007_v22, %v265_v41  ;;  %v2149_v32 = vpack.c.bf16 %v3011_v38, %v3010_v34  ;;  %v3012_v39 = vand.u32 4294901760, %v2547_v3  ;;  %v3013_v55 = vand.u32 4294901760, %v2553_v5 }
  0x7a   :  { %2117 = vmatpush1.bf16.msra.mxu0 %v2612_v40  ;;  %v351_v31 = vand.u32 4294901760, %v350_v26  ;;  %v3015_v56 = vand.u32 4294901760, %v2582_v25  ;;  %v3017_v3 = vand.u32 4294901760, %v2605_v37  ;;  %v2913_v25 = vld [vmem:[%s2979_s2] sm:$0x7] }
  0x7b   :  { %2118 = vmatprep.subr.bf16.mxu0 %v2372_v0  ;;  %v2152_v41 = vpack.c.bf16 %v3013_v55, %v3012_v39 }
  0x7c   :  { %2045 = vmatpush1.bf16.msra.mxu1 %v2044_v15  ;;  %v364_v15 = vsub.f32 %v2618_v51, %v363_v48  ;;  %v2161_v5 = vpack.c.bf16 %v356_v46, %v3017_v3 }
  0x7d   :  { %2046 = vmatprep.subr.bf16.mxu1 %v2372_v0 }
  0x7e   :  { %2120 = vmatpush1.bf16.msra.mxu0 %v2628_v60  ;;  %v365_v26 = vand.u32 4294901760, %v364_v15 }
  0x7f   :  { %2121 = vmatprep.subr.bf16.mxu0 %v2372_v0 }
  0x80   :  { %2048 = vmatpush1.bf16.msra.mxu1 %v2047_v20  ;;  %v2053_v20 = vpack.c.bf16 %v358_v63, %v351_v31  ;;  %v2056_v61 = vpack.c.bf16 %v372_v21, %v365_v26  ;;  %v2137_v63 = vpack.c.bf16 %v3006_v14, %v3005_v8  ;;  %v2158_v31 = vpack.c.bf16 %v3016_v59, %v3015_v56 }
  0x81   :  { %2049 = vmatprep.subr.bf16.mxu1 %v2372_v0 }
  0x82   :  { %2123 = vmatpush1.bf16.msra.mxu0 %v2642_v6 }
  0x83   :  { %2124 = vmatprep.subr.bf16.mxu0 %v2372_v0 }
  0x84   :  { %2051 = vmatpush1.bf16.msra.mxu1 %v2050_v36 }
  0x85   :  { %2052 = vmatprep.subr.bf16.mxu1 %v2372_v0 }
  0x86   :  { %2126 = vmatpush1.bf16.msra.mxu0 %v2660_v19 }
  0x87   :  { %2127 = vmatprep.subr.bf16.mxu0 %v2372_v0 }
  0x88   :  { %2054 = vmatpush1.bf16.msra.mxu1 %v2053_v20 }
  0x89   :  { %2055 = vmatprep.subr.bf16.mxu1 %v2372_v0 }
  0x8a   :  { %2129 = vmatpush1.bf16.msra.mxu0 %v2681_v58 }
  0x8b   :  { %2130 = vmatprep.subr.bf16.mxu0 %v2372_v0 }
  0x8c   :  { %2057 = vmatpush1.bf16.msra.mxu1 %v2056_v61 }
  0x8d   :  { %631 = vmatmul.mubr.f32.vlgmr.msra.gmra.mrb[0].mxu0 %v3000_v11  ;;  %2202 = vmatprep.subr.bf16.mxu1 %v2372_v0 }
  0x8e   :  { %2132 = vmatpush1.bf16.msra.mxu0 %v2131_v4  ;;  %638 = vmatprep.mubr.f32.mxu0 %v3003_v13 }
  0x8f   :  { %2133 = vmatprep.subr.bf16.mxu0 %v2372_v0  ;;  %393 = vmatmul.mubr.f32.vlgmr.msra.gmra.mrb[0].mxu1 %v2625_v57 }
  0x90   :  { %398 = vmatprep.mubr.f32.mxu1 %v2635_v2 }
  0x91   :  { %642 = vmatmul.mubr.f32.gmra.mrb[2].mxu0 %v3004_v62 }
  0x92   :  { %2135 = vmatpush1.bf16.msra.mxu0 %v2134_v12  ;;  %784 = vmatprep.mubr.f32.mxu0 %v2488_v44 }
  0x93   :  { %2136 = vmatprep.subr.bf16.mxu0 %v2372_v0  ;;  %400 = vmatmul.mubr.f32.gmra.mrb[2].mxu1 %v2645_v7 }
  0x96   :  { %2138 = vmatpush1.bf16.msra.mxu0 %v2137_v63 }
  0x97   :  { %2139 = vmatprep.subr.bf16.mxu0 %v2372_v0 }
  0x9a   :  { %2141 = vmatpush1.bf16.msra.mxu0 %v2140_v17 }
  0x9b   :  { %2142 = vmatprep.subr.bf16.mxu0 %v2372_v0 }
  0x9e   :  { %2144 = vmatpush1.bf16.msra.mxu0 %v2143_v23 }
  0x9f   :  { %2145 = vmatprep.subr.bf16.mxu0 %v2372_v0 }
  0xa2   :  { %2147 = vmatpush1.bf16.msra.mxu0 %v2146_v9 }
  0xa3   :  { %2148 = vmatprep.subr.bf16.mxu0 %v2372_v0 }
  0xa6   :  { %2150 = vmatpush1.bf16.msra.mxu0 %v2149_v32 }
  0xa7   :  { %2151 = vmatprep.subr.bf16.mxu0 %v2372_v0 }
  0xaa   :  { %2153 = vmatpush1.bf16.msra.mxu0 %v2152_v41 }
  0xab   :  { %2154 = vmatprep.subr.bf16.mxu0 %v2372_v0 }
  0xae   :  { %2156 = vmatpush1.bf16.msra.mxu0 %v2155_v50 }
  0xaf   :  { %2157 = vmatprep.subr.bf16.mxu0 %v2372_v0 }
  0xb2   :  { %2159 = vmatpush1.bf16.msra.mxu0 %v2158_v31 }
  0xb3   :  { %2160 = vmatprep.subr.bf16.mxu0 %v2372_v0 }
  0xb6   :  { %2162 = vmatpush1.bf16.msra.mxu0 %v2161_v5 }
  0xb7   :  { %2163 = vmatprep.subr.bf16.mxu0 %v2372_v0 }
  0xba   :  { %2165 = vmatpush1.bf16.msra.mxu0 %v2164_v16 }
  0xbb   :  { %2166 = vmatprep.subr.bf16.mxu0 %v2372_v0 }
  0xbd   :  { %786 = vmatmul.mubr.f32.vlgmr.msra.gmra.mrb[0].mxu0 %v2625_v57 }
  0xbe   :  { %2168 = vmatpush1.bf16.msra.mxu0 %v2483_v42  ;;  %791 = vmatprep.mubr.f32.mxu0 %v2635_v2  ;;  %v2374_v42 = vmov 0.0  }
  0xbf   :  { %2169 = vmatprep.subr.bf16.mxu0 %v2372_v0  ;;  %1906 = vmatprep.mubr.msk.f32.mxu1 %vm2373_vm1, %v2374_v42 }
  0xc1   :  { %793 = vmatmul.mubr.f32.gmra.mrb[2].mxu0 %v2645_v7 }
  0xc2   :  { %2171 = vmatpush1.bf16.msra.mxu0 %v2490_v45  ;;  %887 = vmatprep.mubr.f32.mxu0 %v2488_v44 }
  0xc3   :  { %2172 = vmatprep.subr.bf16.mxu0 %v2372_v0 }
  0xc6   :  { %2174 = vmatpush1.bf16.msra.mxu0 %v2517_v54 }
  0xc7   :  { %2175 = vmatprep.subr.bf16.mxu0 %v2372_v0 }
  0xca   :  { %2177 = vmatpush1.bf16.msra.mxu0 %v2544_v1 }
  0xcb   :  { %2178 = vmatprep.subr.bf16.mxu0 %v2372_v0 }
  0xce   :  { %2180 = vmatpush1.bf16.msra.mxu0 %v2561_v10  ;;  %v76_v10 = vlaneseq }
  0xcf   :  { %2181 = vmatprep.subr.bf16.mxu0 %v2372_v0 }
  0xd0   :  { %v77_v18 = vshrl.u32 %v76_v10, 7 }
  0xd2   :  { %2183 = vmatpush1.bf16.msra.mxu0 %v2579_v24  ;;  %v78_v24 = vsub.s32 0, %v77_v18 }
  0xd3   :  { %2184 = vmatprep.subr.bf16.mxu0 %v2372_v0 }
  0xd4   :  { %v79_v28 = vrot.slane %v2913_v25, %v78_v24 }
  0xd6   :  { %2186 = vmatpush1.bf16.msra.mxu0 %v2599_v33 }
  0xd7   :  { %2187 = vmatprep.subr.bf16.mxu0 %v2372_v0 }
  0xda   :  { %2189 = vmatpush1.bf16.msra.mxu0 %v2612_v40 }
  0xdb   :  { %2190 = vmatprep.subr.bf16.mxu0 %v2372_v0 }
  0xde   :  { %2192 = vmatpush1.bf16.msra.mxu0 %v2628_v60 }
  0xdf   :  { %2193 = vmatprep.subr.bf16.mxu0 %v2372_v0 }
  0xe2   :  { %2195 = vmatpush1.bf16.msra.mxu0 %v2642_v6 }
  0xe3   :  { %2196 = vmatprep.subr.bf16.mxu0 %v2372_v0 }
  0xe6   :  { %2198 = vmatpush1.bf16.msra.mxu0 %v2660_v19  ;;  %v912_v19 = vrot.slane %v2913_v25, 1 }
  0xe7   :  { %2199 = vmatprep.subr.bf16.mxu0 %v2372_v0 }
  0xe8   :  { %v2917_v30 = vand.u32 4294901760, %v912_v19 }
  0xea   :  { %2201 = vmatpush1.bf16.msra.mxu0 %v2681_v58  ;;  %v982_v15 = vsub.f32 %v912_v19, %v2917_v30 }
  0xec   :  { %v983_v35 = vand.u32 4294901760, %v982_v15 }
  0xed   :  { %889 = vmatmul.mubr.f32.vlgmr.msra.gmra.mrb[0].mxu0 %v2625_v57 }
  0xee   :  { %894 = vmatprep.mubr.f32.mxu0 %v2635_v2  ;;  %v984_v17 = vsub.f32 %v982_v15, %v983_v35 }
  0xf0   :  { %v985_v39 = vand.u32 4294901760, %v984_v17 }
  0xf1   :  { %896 = vmatmul.mubr.f32.gmra.mrb[2].mxu0 %v2645_v7 }
 0x162   :  { %v394_v44 = vpop.f32.mrb[0].mxu1 }
 0x163   :  { %v396_v45 = vpop.f32.mrb[1].mxu1  ;;  %v2238_v33 = vadd.f32 %v394_v44, %v79_v28 }
 0x164   :  { %v1375_v45 = vrot.slane %v2913_v25, 2 }
 0x166   :  { %v401_v54 = vpop.f32.mrb[2].mxu1 }
 0x167   :  { %v403_v1 = vpop.f32.mrb[3].mxu1  ;;  %v2240_v51 = vadd.f32 %v401_v54, %v79_v28  ;;  %v1444_v54 = vand.u32 4294901760, %v1375_v45 }
 0x169   :  { %v1445_v1 = vsub.f32 %v1375_v45, %v1444_v54 }
 0x16b   :  { %v1446_v10 = vand.u32 4294901760, %v1445_v1 }
 0x16d   :  { %v1447_v18 = vsub.f32 %v1445_v1, %v1446_v10 }
 0x16f   :  { %v1448_v24 = vand.u32 4294901760, %v1447_v18 }
 0x1c0   :  { %v890_v37 = vpop.f32.mrb[0].mxu0 }
 0x1c1   :  { %v2239_v43 = vadd.f32 %v2238_v33, %v890_v37  ;;  %v892_v40 = vpop.f32.mrb[1].mxu0 }
 0x1c3   :  { %v903_v57 = vmul.f32 0.70710677, %v2239_v43  ;;  %v901_v52 = vmul.f32 0.5, %v2239_v43 }
 0x1c4   :  { %v897_v60 = vpop.f32.mrb[2].mxu0 }
 0x1c5   :  { %2288 = verf.f32 %v903_v57  ;;  %v2241_v2 = vadd.f32 %v2240_v51, %v897_v60  ;;  %v899_v6 = vpop.f32.mrb[3].mxu0 }
 0x1c7   :  { %v904_v7 = vmul.f32 0.70710677, %v2241_v2  ;;  %v902_v20 = vmul.f32 0.5, %v2241_v2 }
 0x1c9   :  { %2290 = verf.f32 %v904_v7 }
 0x1cf   :  { %v2289_v58 = vpop.eup %2288 }
 0x1d0   :  { %v907_v46 = vadd.f32 1.0, %v2289_v58 }
 0x1d2   :  { %v909_v48 = vmul.f32 %v907_v46, %v901_v52 }
 0x1d3   :  { %v2291_v36 = vpop.eup %2290 }
 0x1d4   :  { %v915_v47 = vand.u32 4294901760, %v909_v48  ;;  %v1373_v4 = vmul.f32 %v909_v48, %v909_v48  ;;  %v908_v26 = vadd.f32 1.0, %v2291_v36 }
 0x1d6   :  { %v993_v21 = vsub.f32 %v909_v48, %v915_v47  ;;  %v910_v11 = vmul.f32 %v908_v26, %v902_v20  ;;  %v1378_v53 = vand.u32 4294901760, %v1373_v4 }
 0x1d8   :  { %v918_v12 = vand.u32 4294901760, %v910_v11  ;;  %v1374_v13 = vmul.f32 %v910_v11, %v910_v11  ;;  %v994_v61 = vand.u32 4294901760, %v993_v21  ;;  %v1456_v62 = vsub.f32 %v1373_v4, %v1378_v53 }
 0x1da   :  { %v1000_v8 = vsub.f32 %v910_v11, %v918_v12  ;;  %v2203_v14 = vpack.c.bf16 %v918_v12, %v915_v47  ;;  %v1381_v63 = vand.u32 4294901760, %v1374_v13  ;;  %v1457_v22 = vand.u32 4294901760, %v1456_v62 }
 0x1db   :  { %v995_v23 = vsub.f32 %v993_v21, %v994_v61 }
 0x1dc   :  { %2204 = vmatpush3.bf16.xpose.msra.mxu1 %v2203_v14  ;;  %v1001_v27 = vand.u32 4294901760, %v1000_v8  ;;  %v2209_v29 = vpack.c.bf16 %v1000_v8, %v993_v21  ;;  %v2920_v9 = vpack.c.bf16 %v1381_v63, %v1378_v53  ;;  %v1463_v34 = vsub.f32 %v1374_v13, %v1381_v63 }
 0x1dd   :  { %2205 = vmatprep.subr.bf16.mxu1 %v2372_v0  ;;  %v1458_v55 = vsub.f32 %v1456_v62, %v1457_v22  ;;  %v996_v50 = vand.u32 4294901760, %v995_v23 }
 0x1de   :  { %v1002_v38 = vsub.f32 %v1000_v8, %v1001_v27  ;;  %v2215_v32 = vpack.c.bf16 %v1001_v27, %v994_v61  ;;  %v1464_v41 = vand.u32 4294901760, %v1463_v34  ;;  %v2227_v49 = vpack.c.bf16 %v1463_v34, %v1456_v62 }
 0x1df   :  { %v1459_v5 = vand.u32 4294901760, %v1458_v55 }
 0x1e0   :  { %v1003_v56 = vand.u32 4294901760, %v1002_v38  ;;  %v1465_v59 = vsub.f32 %v1463_v34, %v1464_v41  ;;  %v2233_v31 = vpack.c.bf16 %v1464_v41, %v1457_v22 }
 0x1e2   :  { %v2206_v3 = vpack.c.bf16 %v1003_v56, %v996_v50  ;;  %v1466_v16 = vand.u32 4294901760, %v1465_v59 }
 0x1e3   :  { %1907 = vmatmul.mubr.f32.vlgmr.msra.gmra.mrb[4].mxu1 %v985_v39 }
 0x1e4   :  { %2207 = vmatpush3.bf16.xpose.msra.mxu1 %v2206_v3  ;;  %1913 = vmatprep.mubr.msk.f32.mxu1 %vm2373_vm1, %v2374_v42  ;;  %v2224_v44 = vpack.c.bf16 %v1466_v16, %v1459_v5 }
 0x1e5   :  { %2208 = vmatprep.subr.bf16.mxu1 %v2372_v0 }
 0x1eb   :  { %1914 = vmatmul.mubr.f32.vlgmr.msra.gmra.mrb[4].mxu1 %v2917_v30 }
 0x1ec   :  { %2210 = vmatpush3.bf16.xpose.msra.mxu1 %v2209_v29  ;;  %1920 = vmatprep.mubr.msk.f32.mxu1 %vm2373_vm1, %v2374_v42 }
 0x1ed   :  { %2211 = vmatprep.subr.bf16.mxu1 %v2372_v0 }
 0x1f3   :  { %1921 = vmatmul.mubr.f32.vlgmr.msra.gmra.mrb[4].mxu1 %v982_v15 }
 0x1f4   :  { %2213 = vmatpush3.bf16.xpose.msra.mxu1 %v2203_v14  ;;  %1927 = vmatprep.mubr.msk.f32.mxu1 %vm2373_vm1, %v2374_v42 }
 0x1f5   :  { %2214 = vmatprep.subr.bf16.mxu1 %v2372_v0 }
 0x1fb   :  { %1928 = vmatmul.mubr.f32.vlgmr.msra.gmra.mrb[4].mxu1 %v983_v35 }
 0x1fc   :  { %2216 = vmatpush3.bf16.xpose.msra.mxu1 %v2215_v32  ;;  %1934 = vmatprep.mubr.msk.f32.mxu1 %vm2373_vm1, %v2374_v42 }
 0x1fd   :  { %2217 = vmatprep.subr.bf16.mxu1 %v2372_v0 }
 0x203   :  { %1935 = vmatmul.mubr.f32.vlgmr.msra.gmra.mrb[4].mxu1 %v2917_v30 }
 0x204   :  { %2219 = vmatpush3.bf16.xpose.msra.mxu1 %v2203_v14  ;;  %1941 = vmatprep.mubr.msk.f32.mxu1 %vm2373_vm1, %v2374_v42 }
 0x205   :  { %2220 = vmatprep.subr.bf16.mxu1 %v2372_v0 }
 0x20b   :  { %1942 = vmatmul.mubr.f32.vlgmr.msra.gmra.mrb[4].mxu1 %v2917_v30 }
 0x20c   :  { %2222 = vmatpush3.bf16.xpose.msra.mxu1 %v2920_v9  ;;  %1948 = vmatprep.mubr.msk.f32.mxu1 %vm2373_vm1, %v2374_v42 }
 0x20d   :  { %2223 = vmatprep.subr.bf16.mxu1 %v2372_v0 }
 0x213   :  { %1949 = vmatmul.mubr.f32.vlgmr.msra.gmra.mrb[6].mxu1 %v1448_v24 }
 0x214   :  { %2225 = vmatpush3.bf16.xpose.msra.mxu1 %v2224_v44  ;;  %1955 = vmatprep.mubr.msk.f32.mxu1 %vm2373_vm1, %v2374_v42 }
 0x215   :  { %2226 = vmatprep.subr.bf16.mxu1 %v2372_v0 }
 0x21b   :  { %1956 = vmatmul.mubr.f32.vlgmr.msra.gmra.mrb[6].mxu1 %v1444_v54 }
 0x21c   :  { %2228 = vmatpush3.bf16.xpose.msra.mxu1 %v2227_v49  ;;  %1962 = vmatprep.mubr.msk.f32.mxu1 %vm2373_vm1, %v2374_v42 }
 0x21d   :  { %2229 = vmatprep.subr.bf16.mxu1 %v2372_v0 }
 0x223   :  { %1963 = vmatmul.mubr.f32.vlgmr.msra.gmra.mrb[6].mxu1 %v1445_v1 }
 0x224   :  { %2231 = vmatpush3.bf16.xpose.msra.mxu1 %v2920_v9  ;;  %1969 = vmatprep.mubr.msk.f32.mxu1 %vm2373_vm1, %v2374_v42 }
 0x225   :  { %2232 = vmatprep.subr.bf16.mxu1 %v2372_v0 }
 0x22b   :  { %1970 = vmatmul.mubr.f32.vlgmr.msra.gmra.mrb[6].mxu1 %v1446_v10 }
 0x22c   :  { %2234 = vmatpush3.bf16.xpose.msra.mxu1 %v2233_v31  ;;  %1976 = vmatprep.mubr.msk.f32.mxu1 %vm2373_vm1, %v2374_v42 }
 0x22d   :  { %2235 = vmatprep.subr.bf16.mxu1 %v2372_v0  ;;  %v1846_v0 = vstv %s2980_s3 }
 0x233   :  { %1977 = vmatmul.mubr.f32.vlgmr.msra.gmra.mrb[6].mxu1 %v1444_v54 }
 0x234   :  { %2237 = vmatpush3.bf16.xpose.msra.mxu1 %v2920_v9  ;;  %1983 = vmatprep.mubr.msk.f32.mxu1 %vm2373_vm1, %v2374_v42 }
 0x23b   :  { %1984 = vmatmul.mubr.f32.vlgmr.msra.gmra.mrb[6].mxu1 %v1444_v54 }
 0x2de   :  { %v1369_v25 = vpop.f32.mrb[4].mxu1 }
 0x2df   :  { %v1943_v28 = vpop.f32.mrb[5].mxu1  ;;  %v1836_v33 = vmul.f32 %v1369_v25, %v1369_v25 }
 0x2e1   :  { %v1838_v37 = vrot.slane %v1836_v33, 1 }
 0x30e   :  { %v1832_v43 = vpop.f32.mrb[6].mxu1 }
 0x30f   :  { %v1840_v40 = vsub.f32 %v1832_v43, %v1838_v37  ;;  %v1985_v51 = vpop.f32.mrb[7].mxu1 }
 0x311   :  { %v1841_v57 = vmax.f32 %v1840_v40, 0.0 }
 0x313   :  { %v1842_v60 = vadd.f32 1e-12, %v1841_v57 }
 0x315   :  { %2292 = vrsqrt.f32 %v1842_v60 }
 0x31f   :  { %v2293_v2 = vpop.eup %2292 }
 0x320   :  { %v1844_v6 = vmul.f32 %v2293_v2, %v1369_v25 }
 0x322   :  { %v1847_v42 = vadd.f32 %v1846_v0, %v1844_v6 }
 0x324   :  { %1849 = vst.msk [vmem:[#allocation8] sm:$0x1] %vm1848_vm2, %v1847_v42 }
 0x325   :  { %2349 = shalt.err (!%p2346_p6)
}
 0x326   :  { %s2350_s24 = scalar_lea.hbm %s2981_s4, 16 }
 0x327   :  { %p2351_p7 = scmp.ne.s32.totalorder %s2981_s4, %s2350_s24  ;;  %p2354_p8 = scmp.lt.u32.totalorder %s2350_s24, %s2981_s4 }
 0x329   :  { %p2356_p9 = pnand %p2354_p8, %p2351_p7 }
 0x32b   :  { %2359 = shalt.err (!%p2356_p9)
}
 0x32c   :  { %1859 = dma.vmem_to_hbm [thread:$0]  %s1857_s19, 16, %s2981_s4, [#allocation5]  }
 0x32d   :  { %2364 = dma.done.wait [#allocation5], 16  }
 0x32e   :  { %2365 = vsyncadd [#allocation5], 4294967280 }
 0x32f   :  { %1863 = vsyncpa [#allocation4], 1 }
 0x330   :  { %1864 = vsyncpa [#allocation7], 1 }
 0x331   :  { %1865 = vsyncpa [#allocation5], 1 }

</bundles_post_ra>
